<compile_context>
chip_gen: v7x
topology: tpu7x:2x2x1
jax: 0.10.0
libtpu: 0.0.40
codegen_flags: <defaults>
</compile_context>

<pallas_src>
import jax
import jax.numpy as jnp
from jax.experimental import pallas as pl
from jax.experimental.pallas import tpu as pltpu

N_INPUTS = 32
HIDDENS = [544, 272, 136, 68, 1]
LANE = 128
MAX_TILE_B = 256  # batch tile (v6e/v7x); still fine on v5e at this model size


def _round_up(x, m):
    return (x + m - 1) // m * m


def _mlp_kernel(*refs):
    """refs = (x_ref, w1, b1, ..., w5, b5, o_ref). Full fused forward per tile."""
    x_ref = refs[0]
    o_ref = refs[-1]
    wb = refs[1:-1]
    n_layers = len(wb) // 2

    h = x_ref[...]  # bf16, (tile_b, in_pad) lane-dense
    for li in range(n_layers):
        w = wb[2 * li][...]        # bf16 (in_pad, out_pad)
        b = wb[2 * li + 1][...]    # f32  (1, out_pad)
        acc = jnp.dot(h, w, preferred_element_type=jnp.float32) + b
        if li < n_layers - 1:
            acc = jnp.maximum(acc, 0.0)          # ReLU (Dropout = identity, eval)
            h = acc.astype(jnp.bfloat16)          # bf16 feed for next MXU matmul
        else:
            h = acc                               # final layer stays f32
    o_ref[...] = h                                # lane-dense (tile_b, 128) store


def pad_params(params):
    """Zero-pad (W, b) to lane multiples; W -> bf16, b stays f32.

    Padded bias entries are 0 (NOT 0.01) and padded weight rows/cols are 0,
    so padded columns never leak into real outputs.
    """
    padded = []
    for (w, b) in params:
        fi, fo = w.shape
        fi_p, fo_p = _round_up(fi, LANE), _round_up(fo, LANE)
        w_p = jnp.zeros((fi_p, fo_p), jnp.float32).at[:fi, :fo].set(w)
        b_p = jnp.zeros((1, fo_p), jnp.float32).at[:, :fo].set(b)
        padded.append((w_p.astype(jnp.bfloat16), b_p))
    return padded


def mlp_forward(x, params):
    """x: (B, n_inputs) f32.  params: list of (W_(in,out) f32, b_(1,out) f32)."""
    B, n_in = x.shape
    out_dim = params[-1][0].shape[1]

    padded = pad_params(params)
    in_pad = padded[0][0].shape[0]
    out_pad = padded[-1][0].shape[1]

    # Batch tile: large for MXU fill, shrunk (to a sublane multiple) for tiny batches.
    tile_b = min(MAX_TILE_B, max(8, _round_up(B, 8)))
    b_pad = _round_up(B, tile_b)
    grid = (b_pad // tile_b,)

    # Pad batch + input width with zeros; feed MXU in bf16.
    x_p = jnp.pad(x, ((0, b_pad - B), (0, in_pad - n_in))).astype(jnp.bfloat16)

    in_specs = [pl.BlockSpec((tile_b, in_pad), lambda i: (i, 0))]
    flat_params = []
    for (w, b) in padded:
        # Weights/biases: full-array blocks, constant index map (resident across grid).
        in_specs.append(pl.BlockSpec(w.shape, lambda i: (0, 0)))
        in_specs.append(pl.BlockSpec(b.shape, lambda i: (0, 0)))
        flat_params.extend([w, b])

    out_specs = pl.BlockSpec((tile_b, out_pad), lambda i: (i, 0))

    out = pl.pallas_call(
        _mlp_kernel,
        out_shape=jax.ShapeDtypeStruct((b_pad, out_pad), jnp.float32),
        grid_spec=pltpu.PrefetchScalarGridSpec(
            num_scalar_prefetch=0,
            grid=grid,
            in_specs=in_specs,
            out_specs=out_specs,
        ),
        compiler_params=pltpu.CompilerParams(
            dimension_semantics=("parallel",),
        ),
    )(x_p, *flat_params)

    # Strip batch padding and padded output columns (real output is column 0..out_dim).
    return out[:B, :out_dim]


def init_params(key, n_inputs):
    """Deterministic xavier_uniform weights, bias = 0.01 (matches init_weights)."""
    dims = [n_inputs] + HIDDENS
    params = []
    for li in range(len(dims) - 1):
        fan_in, fan_out = dims[li], dims[li + 1]
        key, sub = jax.random.split(key)
        bound = jnp.sqrt(6.0 / (fan_in + fan_out))
        w = jax.random.uniform(sub, (fan_in, fan_out),
                               minval=-bound, maxval=bound, dtype=jnp.float32)
        b = jnp.full((1, fan_out), 0.01, dtype=jnp.float32)
        params.append((w, b))
    return params


def reference_forward(x, params):
    """Pure-JAX reference replicating the kernel's bf16-weight / f32-accum numerics."""
    B, n_in = x.shape
    out_dim = params[-1][0].shape[1]
    padded = pad_params(params)
    in_pad = padded[0][0].shape[0]

    h = jnp.pad(x, ((0, 0), (0, in_pad - n_in))).astype(jnp.bfloat16)
    for li, (w, b) in enumerate(padded):
        acc = jnp.dot(h, w, preferred_element_type=jnp.float32) + b
        if li < len(padded) - 1:
            acc = jnp.maximum(acc, 0.0)
            h = acc.astype(jnp.bfloat16)
        else:
            h = acc
    return h[:, :out_dim]


if __name__ == "__main__":
    key = jax.random.PRNGKey(0)
    key, xk = jax.random.split(key)

    BATCH = 8
    x = jax.random.normal(xk, (BATCH, N_INPUTS), dtype=jnp.float32)
    params = init_params(key, N_INPUTS)

    y = mlp_forward(x, params)
    y = jax.block_until_ready(y)

    y_ref = reference_forward(x, params)
    assert y.shape == (BATCH, 1)
    max_err = jnp.max(jnp.abs(y - y_ref))
    assert jnp.allclose(y, y_ref, atol=2e-3, rtol=2e-3), f"max abs err {max_err}"

    print("KERNEL_OK")
</pallas_src>

<mosaic_0001>
module attributes {stable_mosaic.version = 11 : i64} {
  func.func @_mlp_kernel(%arg0: i32, %arg1: memref<8x128xbf16, #tpu.memory_space<vmem>>, %arg2: memref<128x640xbf16, #tpu.memory_space<vmem>>, %arg3: memref<1x640xf32, #tpu.memory_space<vmem>>, %arg4: memref<640x384xbf16, #tpu.memory_space<vmem>>, %arg5: memref<1x384xf32, #tpu.memory_space<vmem>>, %arg6: memref<384x256xbf16, #tpu.memory_space<vmem>>, %arg7: memref<1x256xf32, #tpu.memory_space<vmem>>, %arg8: memref<256x128xbf16, #tpu.memory_space<vmem>>, %arg9: memref<1x128xf32, #tpu.memory_space<vmem>>, %arg10: memref<128x128xbf16, #tpu.memory_space<vmem>>, %arg11: memref<1x128xf32, #tpu.memory_space<vmem>>, %arg12: memref<8x128xf32, #tpu.memory_space<vmem>>) attributes {dimension_semantics = [#tpu.dimension_semantics<parallel>], iteration_bounds = array<i64: 1>, scalar_prefetch = 0 : i64, scratch_operands = 0 : i64, tpu.core_type = #tpu.core_type<tc>, window_params = [{transform_indices = @transform_0, window_bounds = array<i64: 8, 128>}, {pipeline_mode = #tpu.pipeline_mode<synchronous>, transform_indices = @transform_1, window_bounds = array<i64: 128, 640>}, {pipeline_mode = #tpu.pipeline_mode<synchronous>, transform_indices = @transform_2, window_bounds = array<i64: 1, 640>}, {pipeline_mode = #tpu.pipeline_mode<synchronous>, transform_indices = @transform_3, window_bounds = array<i64: 640, 384>}, {pipeline_mode = #tpu.pipeline_mode<synchronous>, transform_indices = @transform_4, window_bounds = array<i64: 1, 384>}, {pipeline_mode = #tpu.pipeline_mode<synchronous>, transform_indices = @transform_5, window_bounds = array<i64: 384, 256>}, {pipeline_mode = #tpu.pipeline_mode<synchronous>, transform_indices = @transform_6, window_bounds = array<i64: 1, 256>}, {pipeline_mode = #tpu.pipeline_mode<synchronous>, transform_indices = @transform_7, window_bounds = array<i64: 256, 128>}, {pipeline_mode = #tpu.pipeline_mode<synchronous>, transform_indices = @transform_8, window_bounds = array<i64: 1, 128>}, {pipeline_mode = #tpu.pipeline_mode<synchronous>, transform_indices = @transform_9, window_bounds = array<i64: 128, 128>}, {pipeline_mode = #tpu.pipeline_mode<synchronous>, transform_indices = @transform_10, window_bounds = array<i64: 1, 128>}, {transform_indices = @transform_11, window_bounds = array<i64: 8, 128>}]} {
    %c0 = arith.constant 0 : index
    %c0_0 = arith.constant 0 : index
    %0 = vector.load %arg1[%c0, %c0_0] : memref<8x128xbf16, #tpu.memory_space<vmem>>, vector<8x128xbf16>
    %c0_1 = arith.constant 0 : index
    %c0_2 = arith.constant 0 : index
    %1 = vector.load %arg2[%c0_1, %c0_2] : memref<128x640xbf16, #tpu.memory_space<vmem>>, vector<128x640xbf16>
    %c0_3 = arith.constant 0 : index
    %c0_4 = arith.constant 0 : index
    %2 = vector.load %arg3[%c0_3, %c0_4] : memref<1x640xf32, #tpu.memory_space<vmem>>, vector<1x640xf32>
    %cst = arith.constant dense<0.000000e+00> : vector<8x640xf32>
    %3 = tpu.matmul %0, %1, %cst {dimension_numbers = #tpu.dot_dimension_numbers<[1], [0], [0], [1], [0, 0, 1, 1], [], []>} : vector<8x128xbf16>, vector<128x640xbf16>, vector<8x640xf32> -> vector<8x640xf32>
    %4 = vector.broadcast %2 : vector<1x640xf32> to vector<8x640xf32>
    %5 = arith.addf %3, %4 : vector<8x640xf32>
    %cst_5 = arith.constant 0.000000e+00 : f32
    %6 = vector.broadcast %cst_5 : f32 to vector<8x640xf32>
    %7 = arith.maximumf %5, %6 : vector<8x640xf32>
    %8 = arith.truncf %7 : vector<8x640xf32> to vector<8x640xbf16>
    %c0_6 = arith.constant 0 : index
    %c0_7 = arith.constant 0 : index
    %9 = vector.load %arg4[%c0_6, %c0_7] : memref<640x384xbf16, #tpu.memory_space<vmem>>, vector<640x384xbf16>
    %c0_8 = arith.constant 0 : index
    %c0_9 = arith.constant 0 : index
    %10 = vector.load %arg5[%c0_8, %c0_9] : memref<1x384xf32, #tpu.memory_space<vmem>>, vector<1x384xf32>
    %cst_10 = arith.constant dense<0.000000e+00> : vector<8x384xf32>
    %11 = tpu.matmul %8, %9, %cst_10 {dimension_numbers = #tpu.dot_dimension_numbers<[1], [0], [0], [1], [0, 0, 1, 1], [], []>} : vector<8x640xbf16>, vector<640x384xbf16>, vector<8x384xf32> -> vector<8x384xf32>
    %12 = vector.broadcast %10 : vector<1x384xf32> to vector<8x384xf32>
    %13 = arith.addf %11, %12 : vector<8x384xf32>
    %cst_11 = arith.constant 0.000000e+00 : f32
    %14 = vector.broadcast %cst_11 : f32 to vector<8x384xf32>
    %15 = arith.maximumf %13, %14 : vector<8x384xf32>
    %16 = arith.truncf %15 : vector<8x384xf32> to vector<8x384xbf16>
    %c0_12 = arith.constant 0 : index
    %c0_13 = arith.constant 0 : index
    %17 = vector.load %arg6[%c0_12, %c0_13] : memref<384x256xbf16, #tpu.memory_space<vmem>>, vector<384x256xbf16>
    %c0_14 = arith.constant 0 : index
    %c0_15 = arith.constant 0 : index
    %18 = vector.load %arg7[%c0_14, %c0_15] : memref<1x256xf32, #tpu.memory_space<vmem>>, vector<1x256xf32>
    %cst_16 = arith.constant dense<0.000000e+00> : vector<8x256xf32>
    %19 = tpu.matmul %16, %17, %cst_16 {dimension_numbers = #tpu.dot_dimension_numbers<[1], [0], [0], [1], [0, 0, 1, 1], [], []>} : vector<8x384xbf16>, vector<384x256xbf16>, vector<8x256xf32> -> vector<8x256xf32>
    %20 = vector.broadcast %18 : vector<1x256xf32> to vector<8x256xf32>
    %21 = arith.addf %19, %20 : vector<8x256xf32>
    %cst_17 = arith.constant 0.000000e+00 : f32
    %22 = vector.broadcast %cst_17 : f32 to vector<8x256xf32>
    %23 = arith.maximumf %21, %22 : vector<8x256xf32>
    %24 = arith.truncf %23 : vector<8x256xf32> to vector<8x256xbf16>
    %c0_18 = arith.constant 0 : index
    %c0_19 = arith.constant 0 : index
    %25 = vector.load %arg8[%c0_18, %c0_19] : memref<256x128xbf16, #tpu.memory_space<vmem>>, vector<256x128xbf16>
    %c0_20 = arith.constant 0 : index
    %c0_21 = arith.constant 0 : index
    %26 = vector.load %arg9[%c0_20, %c0_21] : memref<1x128xf32, #tpu.memory_space<vmem>>, vector<1x128xf32>
    %cst_22 = arith.constant dense<0.000000e+00> : vector<8x128xf32>
    %27 = tpu.matmul %24, %25, %cst_22 {dimension_numbers = #tpu.dot_dimension_numbers<[1], [0], [0], [1], [0, 0, 1, 1], [], []>} : vector<8x256xbf16>, vector<256x128xbf16>, vector<8x128xf32> -> vector<8x128xf32>
    %28 = vector.broadcast %26 : vector<1x128xf32> to vector<8x128xf32>
    %29 = arith.addf %27, %28 : vector<8x128xf32>
    %cst_23 = arith.constant 0.000000e+00 : f32
    %30 = vector.broadcast %cst_23 : f32 to vector<8x128xf32>
    %31 = arith.maximumf %29, %30 : vector<8x128xf32>
    %32 = arith.truncf %31 : vector<8x128xf32> to vector<8x128xbf16>
    %c0_24 = arith.constant 0 : index
    %c0_25 = arith.constant 0 : index
    %33 = vector.load %arg10[%c0_24, %c0_25] : memref<128x128xbf16, #tpu.memory_space<vmem>>, vector<128x128xbf16>
    %c0_26 = arith.constant 0 : index
    %c0_27 = arith.constant 0 : index
    %34 = vector.load %arg11[%c0_26, %c0_27] : memref<1x128xf32, #tpu.memory_space<vmem>>, vector<1x128xf32>
    %cst_28 = arith.constant dense<0.000000e+00> : vector<8x128xf32>
    %35 = tpu.matmul %32, %33, %cst_28 {dimension_numbers = #tpu.dot_dimension_numbers<[1], [0], [0], [1], [0, 0, 1, 1], [], []>} : vector<8x128xbf16>, vector<128x128xbf16>, vector<8x128xf32> -> vector<8x128xf32>
    %36 = vector.broadcast %34 : vector<1x128xf32> to vector<8x128xf32>
    %37 = arith.addf %35, %36 : vector<8x128xf32>
    %c0_29 = arith.constant 0 : index
    %c0_30 = arith.constant 0 : index
    %38 = vector.load %arg12[%c0_29, %c0_30] : memref<8x128xf32, #tpu.memory_space<vmem>>, vector<8x128xf32>
    tpu.vector_store %arg12[%c0_29, %c0_30], %37 {strides = array<i32>} : memref<8x128xf32, #tpu.memory_space<vmem>>, vector<8x128xf32>,
    return
  }
  func.func @transform_0(%arg0: i32) -> (i32, i32) {
    %c0_i32 = arith.constant 0 : i32
    %c0_i32_0 = arith.constant 0 : i32
    return %arg0, %c0_i32 : i32, i32
  }
  func.func @transform_1(%arg0: i32) -> (i32, i32) {
    %c0_i32 = arith.constant 0 : i32
    %c0_i32_0 = arith.constant 0 : i32
    %c0_i32_1 = arith.constant 0 : i32
    return %c0_i32, %c0_i32_0 : i32, i32
  }
  func.func @transform_2(%arg0: i32) -> (i32, i32) {
    %c0_i32 = arith.constant 0 : i32
    %c0_i32_0 = arith.constant 0 : i32
    %c0_i32_1 = arith.constant 0 : i32
    return %c0_i32, %c0_i32_0 : i32, i32
  }
  func.func @transform_3(%arg0: i32) -> (i32, i32) {
    %c0_i32 = arith.constant 0 : i32
    %c0_i32_0 = arith.constant 0 : i32
    %c0_i32_1 = arith.constant 0 : i32
    return %c0_i32, %c0_i32_0 : i32, i32
  }
  func.func @transform_4(%arg0: i32) -> (i32, i32) {
    %c0_i32 = arith.constant 0 : i32
    %c0_i32_0 = arith.constant 0 : i32
    %c0_i32_1 = arith.constant 0 : i32
    return %c0_i32, %c0_i32_0 : i32, i32
  }
  func.func @transform_5(%arg0: i32) -> (i32, i32) {
    %c0_i32 = arith.constant 0 : i32
    %c0_i32_0 = arith.constant 0 : i32
    %c0_i32_1 = arith.constant 0 : i32
    return %c0_i32, %c0_i32_0 : i32, i32
  }
  func.func @transform_6(%arg0: i32) -> (i32, i32) {
    %c0_i32 = arith.constant 0 : i32
    %c0_i32_0 = arith.constant 0 : i32
    %c0_i32_1 = arith.constant 0 : i32
    return %c0_i32, %c0_i32_0 : i32, i32
  }
  func.func @transform_7(%arg0: i32) -> (i32, i32) {
    %c0_i32 = arith.constant 0 : i32
    %c0_i32_0 = arith.constant 0 : i32
    %c0_i32_1 = arith.constant 0 : i32
    return %c0_i32, %c0_i32_0 : i32, i32
  }
  func.func @transform_8(%arg0: i32) -> (i32, i32) {
    %c0_i32 = arith.constant 0 : i32
    %c0_i32_0 = arith.constant 0 : i32
    %c0_i32_1 = arith.constant 0 : i32
    return %c0_i32, %c0_i32_0 : i32, i32
  }
  func.func @transform_9(%arg0: i32) -> (i32, i32) {
    %c0_i32 = arith.constant 0 : i32
    %c0_i32_0 = arith.constant 0 : i32
    %c0_i32_1 = arith.constant 0 : i32
    return %c0_i32, %c0_i32_0 : i32, i32
  }
  func.func @transform_10(%arg0: i32) -> (i32, i32) {
    %c0_i32 = arith.constant 0 : i32
    %c0_i32_0 = arith.constant 0 : i32
    %c0_i32_1 = arith.constant 0 : i32
    return %c0_i32, %c0_i32_0 : i32, i32
  }
  func.func @transform_11(%arg0: i32) -> (i32, i32) {
    %c0_i32 = arith.constant 0 : i32
    %c0_i32_0 = arith.constant 0 : i32
    return %arg0, %c0_i32 : i32, i32
  }
}

</mosaic_0001>

<bundles_post_ra>
// kernel: tpu_custom_call.1
= control target key start
LH: loop header
LB: loop body
LE: loop exit
PB: predicated region body
PF: predicated region fallthrough
CT: control target
= control target key end

     0   :  { %16 = vsyncpa [#allocation3], 0  ;;  %s3447_s0 = inlined_call_operand.hbm [shape: bf16[8,128], index: 0, kind: input, shape index: {}]   ;;  %s3448_s1 = inlined_call_operand.hbm [shape: bf16[128,640], index: 1, kind: input, shape index: {}]   ;;  %s3449_s2 = inlined_call_operand.vmem [shape: f32[1,640], index: 2, kind: input, shape index: {}]   ;;  %s3450_s3 = inlined_call_operand.hbm [shape: bf16[640,384], index: 3, kind: input, shape index: {}]   ;;  %s3451_s4 = inlined_call_operand.vmem [shape: f32[1,384], index: 4, kind: input, shape index: {}]   ;;  %s3452_s5 = inlined_call_operand.hbm [shape: bf16[384,256], index: 5, kind: input, shape index: {}]   ;;  %s3453_s6 = inlined_call_operand.vmem [shape: f32[1,256], index: 6, kind: input, shape index: {}]   ;;  %s3454_s7 = inlined_call_operand.hbm [shape: bf16[256,128], index: 7, kind: input, shape index: {}]   ;;  %s3455_s8 = inlined_call_operand.vmem [shape: f32[1,128], index: 8, kind: input, shape index: {}]   ;;  %s3456_s9 = inlined_call_operand.hbm [shape: bf16[128,128], index: 9, kind: input, shape index: {}]   ;;  %s3457_s10 = inlined_call_operand.vmem [shape: f32[1,128], index: 10, kind: input, shape index: {}]   ;;  %s3458_s11 = inlined_call_operand.hbm [shape: f32[8,128], index: 11, kind: output, shape index: {}]  }
   0x1   :  { %17 = vsyncpa [#allocation6], 0 }
   0x2   :  { %18 = vsyncpa [#allocation9], 0 }
   0x3   :  { %19 = vsyncpa [#allocation12], 0 }
   0x4   :  { %20 = vsyncpa [#allocation4], 0  ;;  %s3192_s17 = smov [#allocation5]   ;;  %s3028_s21 = scalar_lea.hbm %s3448_s1, 5120 }
   0x5   :  { %s36_s18 = sshll.u32 %s3192_s17, 4  ;;  %p3029_p0 = scmp.ne.s32.totalorder %s3448_s1, %s3028_s21  ;;  %s37_s18 = int_to_ptr.vmem [resolvable:$true] %s36_s18 }
   0x6   :  { %p3032_p1 = scmp.lt.u32.totalorder %s3028_s21, %s3448_s1 }
   0x8   :  { %p3034_p2 = pnand %p3032_p1, %p3029_p0 }
   0xa   :  { %3037 = shalt.err (!%p3034_p2)
}
   0xb   :  { %s3038_s26 = scalar_lea.vmem %s37_s18, 5120  ;;  %p3043_p4 = scmp.lt.s32.totalorder %s37_s18, %s37_s18 }
   0xc   :  { %p3039_p3 = scmp.ne.s32.totalorder %s37_s18, %s3038_s26  ;;  %p3044_p5 = scmp.lt.s32.totalorder %s3038_s26, %s3038_s26 }
   0xe   :  { %p3045_p6 = por %p3044_p5, %p3043_p4 }
  0x10   :  { %p3046_p7 = pnand %p3045_p6, %p3039_p3 }
  0x12   :  { %3049 = shalt.err (!%p3046_p7)
}
  0x13   :  { %s3193_s27 = smov 320   ;;  %s3194_s28 = smov 20  }
  0x14   :  { %42 = dma.hbm_to_vmem [thread:$0]  %s3448_s1, 5120, %s37_s18, [#allocation6], %s3193_s27, %s3193_s27, %s3194_s28  }
  0x15   :  { %s3195_s12 = smov [#allocation8]   ;;  %s3050_s16 = scalar_lea.hbm %s3452_s5, 6144 }
  0x16   :  { %s64_s13 = sshll.u32 %s3195_s12, 4  ;;  %p3051_p8 = scmp.ne.s32.totalorder %s3452_s5, %s3050_s16  ;;  %s65_s13 = int_to_ptr.vmem [resolvable:$true] %s64_s13 }
  0x17   :  { %p3054_p9 = scmp.lt.u32.totalorder %s3050_s16, %s3452_s5 }
  0x19   :  { %p3056_p10 = pnand %p3054_p9, %p3051_p8 }
  0x1b   :  { %3059 = shalt.err (!%p3056_p10)
}
  0x1c   :  { %s3060_s22 = scalar_lea.vmem %s65_s13, 6144  ;;  %p3065_p12 = scmp.lt.s32.totalorder %s65_s13, %s65_s13 }
  0x1d   :  { %p3061_p11 = scmp.ne.s32.totalorder %s65_s13, %s3060_s22  ;;  %p3066_p13 = scmp.lt.s32.totalorder %s3060_s22, %s3060_s22 }
  0x1f   :  { %p3067_p0 = por %p3066_p13, %p3065_p12 }
  0x21   :  { %p3068_p1 = pnand %p3067_p0, %p3061_p11 }
  0x23   :  { %3071 = shalt.err (!%p3068_p1)
}
  0x24   :  { %s3196_s1 = smov 128   ;;  %s3197_s18 = smov 8  }
  0x25   :  { %70 = dma.hbm_to_vmem [thread:$0]  %s3452_s5, 6144, %s65_s13, [#allocation9], %s3196_s1, %s3196_s1, %s3197_s18  }
  0x26   :  { %s3198_s25 = smov [#allocation2]   ;;  %s3199_s27 = smov [#allocation7]  }
  0x27   :  { %s27_s26 = sshll.u32 %s3198_s25, 4  ;;  %s50_s28 = sshll.u32 %s3199_s27, 4  ;;  %s28_s26 = int_to_ptr.vmem [resolvable:$true] %s27_s26  ;;  %s3294_s28 = int_to_ptr.vmem [resolvable:$true] %s50_s28 }
  0x28   :  { %s3072_s12 = scalar_lea.hbm %s3447_s0, 64 }
  0x29   :  { %p3073_p2 = scmp.ne.s32.totalorder %s3447_s0, %s3072_s12  ;;  %p3076_p3 = scmp.lt.u32.totalorder %s3072_s12, %s3447_s0 }
  0x2b   :  { %p3078_p4 = pnand %p3076_p3, %p3073_p2 }
  0x2d   :  { %3081 = shalt.err (!%p3078_p4)
}
  0x2e   :  { %s3082_s5 = scalar_lea.vmem %s28_s26, 64  ;;  %p3087_p6 = scmp.lt.s32.totalorder %s28_s26, %s28_s26 }
  0x2f   :  { %p3083_p5 = scmp.ne.s32.totalorder %s28_s26, %s3082_s5  ;;  %p3088_p7 = scmp.lt.s32.totalorder %s3082_s5, %s3082_s5 }
  0x31   :  { %p3089_p8 = por %p3088_p7, %p3087_p6 }
  0x33   :  { %p3090_p9 = pnand %p3089_p8, %p3083_p5 }
  0x35   :  { %3093 = shalt.err (!%p3090_p9)
}
  0x36   :  { %30 = dma.hbm_to_vmem [thread:$0]  %s3447_s0, 64, %s28_s26, [#allocation3]  }
  0x37   :  { %s3094_s22 = scalar_lea.hbm %s3450_s3, 15360 }
  0x38   :  { %p3095_p10 = scmp.ne.s32.totalorder %s3450_s3, %s3094_s22  ;;  %p3098_p11 = scmp.lt.u32.totalorder %s3094_s22, %s3450_s3 }
  0x3a   :  { %p3100_p12 = pnand %p3098_p11, %p3095_p10 }
  0x3c   :  { %3103 = shalt.err (!%p3100_p12)
}
  0x3d   :  { %s3104_s25 = scalar_lea.vmem %s3294_s28, 15360  ;;  %p3109_p0 = scmp.lt.s32.totalorder %s3294_s28, %s3294_s28 }
  0x3e   :  { %p3105_p13 = scmp.ne.s32.totalorder %s3294_s28, %s3104_s25  ;;  %p3110_p1 = scmp.lt.s32.totalorder %s3104_s25, %s3104_s25 }
  0x40   :  { %p3111_p2 = por %p3110_p1, %p3109_p0 }
  0x42   :  { %p3112_p3 = pnand %p3111_p2, %p3105_p13 }
  0x44   :  { %3115 = shalt.err (!%p3112_p3)
}
  0x45   :  { %s3200_s0 = smov 192   ;;  %s3201_s26 = smov 12  }
  0x46   :  { %56 = dma.hbm_to_vmem [thread:$0]  %s3450_s3, 15360, %s3294_s28, [#allocation6], %s3200_s0, %s3200_s0, %s3201_s26  }
  0x47   :  { %s3202_s30 = smov [#allocation10]   ;;  %s3116_s16 = scalar_lea.hbm %s3454_s7, 2048 }
  0x48   :  { %s78_s12 = sshll.u32 %s3202_s30, 4  ;;  %p3117_p4 = scmp.ne.s32.totalorder %s3454_s7, %s3116_s16  ;;  %s79_s12 = int_to_ptr.vmem [resolvable:$true] %s78_s12 }
  0x49   :  { %p3120_p5 = scmp.lt.u32.totalorder %s3116_s16, %s3454_s7 }
  0x4b   :  { %p3122_p6 = pnand %p3120_p5, %p3117_p4 }
  0x4d   :  { %3125 = shalt.err (!%p3122_p6)
}
  0x4e   :  { %s3126_s20 = scalar_lea.vmem %s79_s12, 2048  ;;  %p3131_p8 = scmp.lt.s32.totalorder %s79_s12, %s79_s12 }
  0x4f   :  { %p3127_p7 = scmp.ne.s32.totalorder %s79_s12, %s3126_s20  ;;  %p3132_p9 = scmp.lt.s32.totalorder %s3126_s20, %s3126_s20 }
  0x51   :  { %p3133_p10 = por %p3132_p9, %p3131_p8 }
  0x53   :  { %p3134_p11 = pnand %p3133_p10, %p3127_p7 }
  0x55   :  { %3137 = shalt.err (!%p3134_p11)
}
  0x56   :  { %s3203_s3 = smov 64   ;;  %s3204_s28 = smov 4  }
  0x57   :  { %84 = dma.hbm_to_vmem [thread:$0]  %s3454_s7, 2048, %s79_s12, [#allocation9], %s3203_s3, %s3203_s3, %s3204_s28  }
  0x58   :  { %s3205_s1 = smov [#allocation11]   ;;  %s3138_s25 = scalar_lea.hbm %s3456_s9, 1024 }
  0x59   :  { %s92_s18 = sshll.u32 %s3205_s1, 4  ;;  %p3139_p12 = scmp.ne.s32.totalorder %s3456_s9, %s3138_s25  ;;  %s93_s18 = int_to_ptr.vmem [resolvable:$true] %s92_s18 }
  0x5a   :  { %p3142_p13 = scmp.lt.u32.totalorder %s3138_s25, %s3456_s9 }
  0x5c   :  { %p3144_p0 = pnand %p3142_p13, %p3139_p12 }
  0x5e   :  { %3147 = shalt.err (!%p3144_p0)
}
  0x5f   :  { %s3148_s30 = scalar_lea.vmem %s93_s18, 1024  ;;  %p3153_p2 = scmp.lt.s32.totalorder %s93_s18, %s93_s18 }
  0x60   :  { %p3149_p1 = scmp.ne.s32.totalorder %s93_s18, %s3148_s30  ;;  %p3154_p3 = scmp.lt.s32.totalorder %s3148_s30, %s3148_s30 }
  0x62   :  { %p3155_p4 = por %p3154_p3, %p3153_p2 }
  0x64   :  { %p3156_p5 = pnand %p3155_p4, %p3149_p1 }
  0x66   :  { %3159 = shalt.err (!%p3156_p5)
}
  0x67   :  { %98 = dma.hbm_to_vmem [thread:$0]  %s3456_s9, 1024, %s93_s18, [#allocation12], %s3203_s3, %s3203_s3, %s3204_s28  }
  0x68   :  { %3182 = dma.done.wait [#allocation3], 64  }
  0x69   :  { %3183 = vsyncadd [#allocation3], 4294967232 }
  0x6a   :  { %3184 = dma.done.wait [#allocation6], 20480  }
  0x6b   :  { %3185 = vsyncadd [#allocation6], 4294946816 }
  0x6c   :  { %3186 = dma.done.wait [#allocation9], 8192  }
  0x6d   :  { %3187 = vsyncadd [#allocation9], 4294959104 }
  0x6e   :  { %3188 = dma.done.wait [#allocation12], 1024  }
  0x6f   :  { %3189 = vsyncadd [#allocation12], 4294966272  ;;  %v3206_v0 = vmov 0   ;;  %v2716_v1 = vld [vmem:[#allocation5 + $0x4] ss:$20 sps:$4 sm:$0xff]   ;;  %v3207_v32 = vmov 0.0  }
  0x70   :  { %436 = vmatprep.mubr.bf16.mxu0 %v3206_v0  ;;  %477 = vmatprep.mubr.bf16.mxu1 %v3206_v0  ;;  %v2718_v2 = vld [vmem:[#allocation5] ss:$20 sps:$4 sm:$0xff]   ;;  %v2721_v4 = vld [vmem:[#allocation5 + $0x28] ss:$20 sps:$4 sm:$0xff]   ;;  %v2724_v6 = vld [vmem:[#allocation5 + $0x50] ss:$20 sps:$4 sm:$0xff]  }
  0x71   :  { %404 = vmatprep.subr.bf16.mxu0 %v2716_v1  ;;  %v2719_v3 = vld [vmem:[#allocation5 + $0x2c] ss:$20 sps:$4 sm:$0xff]   ;;  %v2722_v5 = vld [vmem:[#allocation5 + $0x54] ss:$20 sps:$4 sm:$0xff]   ;;  %v2725_v7 = vld [vmem:[#allocation5 + $0x7c] ss:$20 sps:$4 sm:$0xff]  }
  0x72   :  { %405 = vmatpush1.bf16.msra.mxu0 %v2718_v2  ;;  %v2727_v8 = vld [vmem:[#allocation5 + $0x78] ss:$20 sps:$4 sm:$0xff]   ;;  %v2742_v11 = vld [vmem:[#allocation5 + $0x8] ss:$20 sps:$4 sm:$0xff]   ;;  %v2730_v13 = vld [vmem:[#allocation5 + $0xa0] ss:$20 sps:$4 sm:$0xff]  }
  0x73   :  { %406 = vmatprep.subr.bf16.mxu0 %v2719_v3  ;;  %v2728_v9 = vld [vmem:[#allocation5 + $0xa4] ss:$20 sps:$4 sm:$0xff]   ;;  %v2740_v10 = vld [vmem:[#allocation5 + $0xc] ss:$20 sps:$4 sm:$0xff]   ;;  %v2743_v12 = vld [vmem:[#allocation5 + $0x34] ss:$20 sps:$4 sm:$0xff]  }
  0x74   :  { %445 = vmatprep.subr.bf16.mxu1 %v2740_v10  ;;  %v2745_v14 = vld [vmem:[#allocation5 + $0x30] ss:$20 sps:$4 sm:$0xff]   ;;  %v2731_v16 = vld [vmem:[#allocation5 + $0xcc] ss:$20 sps:$4 sm:$0xff]   ;;  %v2733_v17 = vld [vmem:[#allocation5 + $0xc8] ss:$20 sps:$4 sm:$0xff]  }
  0x75   :  { %446 = vmatpush1.bf16.msra.mxu1 %v2742_v11  ;;  %v2746_v15 = vld [vmem:[#allocation5 + $0x5c] ss:$20 sps:$4 sm:$0xff]   ;;  %v2748_v18 = vld [vmem:[#allocation5 + $0x58] ss:$20 sps:$4 sm:$0xff]   ;;  %v2734_v20 = vld [vmem:[#allocation5 + $0xf4] ss:$20 sps:$4 sm:$0xff]  }
  0x76   :  { %407 = vmatpush1.bf16.msra.mxu0 %v2721_v4  ;;  %447 = vmatprep.subr.bf16.mxu1 %v2743_v12  ;;  %v2749_v19 = vld [vmem:[#allocation5 + $0x84] ss:$20 sps:$4 sm:$0xff]   ;;  %v2751_v22 = vld [vmem:[#allocation5 + $0x80] ss:$20 sps:$4 sm:$0xff]   ;;  %v2737_v24 = vld [vmem:[#allocation5 + $0x11c] ss:$20 sps:$4 sm:$0xff]  }
  0x77   :  { %408 = vmatprep.subr.bf16.mxu0 %v2722_v5  ;;  %v2736_v21 = vld [vmem:[#allocation5 + $0xf0] ss:$20 sps:$4 sm:$0xff]   ;;  %v2752_v23 = vld [vmem:[#allocation5 + $0xac] ss:$20 sps:$4 sm:$0xff]   ;;  %v2754_v26 = vld [vmem:[#allocation5 + $0xa8] ss:$20 sps:$4 sm:$0xff]  }
  0x78   :  { %v2739_v25 = vld [vmem:[#allocation5 + $0x118] ss:$20 sps:$4 sm:$0xff]   ;;  %v2755_v27 = vld [vmem:[#allocation5 + $0xd4] ss:$20 sps:$4 sm:$0xff]   ;;  %v3351_v28 = vld [vmem:[#allocation2] sm:$0xf] }
  0x79   :  { %448 = vmatpush1.bf16.msra.mxu1 %v2745_v14  ;;  %v2757_v29 = vld [vmem:[#allocation5 + $0xd0] ss:$20 sps:$4 sm:$0xff]   ;;  %v2760_v33 = vld [vmem:[#allocation5 + $0xf8] ss:$20 sps:$4 sm:$0xff]   ;;  %vm3208_vm0 = vmmov 0   ;;  %s3209_s19 = smov [#allocation13]  }
  0x7a   :  { %409 = vmatpush1.bf16.msra.mxu0 %v2724_v6  ;;  %449 = vmatprep.subr.bf16.mxu1 %v2746_v15  ;;  %v2758_v30 = vld [vmem:[#allocation5 + $0xfc] ss:$20 sps:$4 sm:$0xff]   ;;  %v2761_v34 = vld [vmem:[#allocation5 + $0x124] ss:$20 sps:$4 sm:$0xff]   ;;  %v2763_v36 = vld [vmem:[#allocation5 + $0x120] ss:$20 sps:$4 sm:$0xff]  }
  0x7b   :  { %410 = vmatprep.subr.bf16.mxu0 %v2725_v7  ;;  %v2764_v31 = vld [vmem:[#allocation5 + $0x10] ss:$20 sps:$4 sm:$0xff]   ;;  %v2765_v35 = vld [vmem:[#allocation5 + $0x38] ss:$20 sps:$4 sm:$0xff]   ;;  %v2766_v37 = vld [vmem:[#allocation5 + $0x60] ss:$20 sps:$4 sm:$0xff]  }
  0x7c   :  { %v2774_v38 = vld [vmem:[#allocation7 + $0x4] ss:$12 sps:$4 sm:$0xff]   ;;  %v2767_v39 = vld [vmem:[#allocation5 + $0x88] ss:$20 sps:$4 sm:$0xff]   ;;  %v2772_v40 = vld [vmem:[#allocation7] ss:$12 sps:$4 sm:$0xff]  }
  0x7d   :  { %450 = vmatpush1.bf16.msra.mxu1 %v2748_v18  ;;  %v2777_v41 = vld [vmem:[#allocation7 + $0x1c] ss:$12 sps:$4 sm:$0xff]   ;;  %v2768_v42 = vld [vmem:[#allocation5 + $0xb0] ss:$20 sps:$4 sm:$0xff]   ;;  %v2780_v44 = vld [vmem:[#allocation7 + $0x34] ss:$12 sps:$4 sm:$0xff]  }
  0x7e   :  { %411 = vmatpush1.bf16.msra.mxu0 %v2727_v8  ;;  %451 = vmatprep.subr.bf16.mxu1 %v2749_v19  ;;  %v2775_v43 = vld [vmem:[#allocation7 + $0x18] ss:$12 sps:$4 sm:$0xff]   ;;  %v2778_v45 = vld [vmem:[#allocation7 + $0x30] ss:$12 sps:$4 sm:$0xff]   ;;  %v2770_v48 = vld [vmem:[#allocation5 + $0x100] ss:$20 sps:$4 sm:$0xff]  }
  0x7f   :  { %412 = vmatprep.subr.bf16.mxu0 %v2728_v9  ;;  %v2769_v46 = vld [vmem:[#allocation5 + $0xd8] ss:$20 sps:$4 sm:$0xff]   ;;  %v2781_v49 = vld [vmem:[#allocation7 + $0x48] ss:$12 sps:$4 sm:$0xff]   ;;  %v2786_v50 = vld [vmem:[#allocation7 + $0x64] ss:$12 sps:$4 sm:$0xff]  }
  0x80   :  { %v2783_v47 = vld [vmem:[#allocation7 + $0x4c] ss:$12 sps:$4 sm:$0xff]   ;;  %v2771_v51 = vld [vmem:[#allocation5 + $0x128] ss:$20 sps:$4 sm:$0xff]   ;;  %v2792_v56 = vld [vmem:[#allocation7 + $0x94] ss:$12 sps:$4 sm:$0xff]  }
  0x81   :  { %452 = vmatpush1.bf16.msra.mxu1 %v2751_v22  ;;  %v2784_v52 = vld [vmem:[#allocation7 + $0x60] ss:$12 sps:$4 sm:$0xff]   ;;  %v2789_v53 = vld [vmem:[#allocation7 + $0x7c] ss:$12 sps:$4 sm:$0xff]   ;;  %v2787_v54 = vld [vmem:[#allocation7 + $0x78] ss:$12 sps:$4 sm:$0xff]  }
  0x82   :  { %413 = vmatpush1.bf16.msra.mxu0 %v2730_v13  ;;  %453 = vmatprep.subr.bf16.mxu1 %v2752_v23  ;;  %v2799_v55 = vld [vmem:[#allocation7 + $0xc8] ss:$12 sps:$4 sm:$0xff]   ;;  %v2804_v58 = vld [vmem:[#allocation7 + $0xe0] ss:$12 sps:$4 sm:$0xff]   ;;  %v2790_v59 = vld [vmem:[#allocation7 + $0x90] ss:$12 sps:$4 sm:$0xff]  }
  0x83   :  { %414 = vmatprep.subr.bf16.mxu0 %v2731_v16  ;;  %v2800_v57 = vld [vmem:[#allocation7 + $0x8] ss:$12 sps:$4 sm:$0xff]   ;;  %v2795_v60 = vld [vmem:[#allocation7 + $0xac] ss:$12 sps:$4 sm:$0xff]   ;;  %v2798_v1 = vld [vmem:[#allocation7 + $0xc4] ss:$12 sps:$4 sm:$0xff]  }
  0x84   :  { %v2805_v61 = vld [vmem:[#allocation7 + $0x20] ss:$12 sps:$4 sm:$0xff]   ;;  %v2809_v62 = vld [vmem:[#allocation7 + $0xf8] ss:$12 sps:$4 sm:$0xff]   ;;  %v2793_v63 = vld [vmem:[#allocation7 + $0xa8] ss:$12 sps:$4 sm:$0xff]  }
  0x85   :  { %454 = vmatpush1.bf16.msra.mxu1 %v2754_v26  ;;  %v2810_v2 = vld [vmem:[#allocation7 + $0x38] ss:$12 sps:$4 sm:$0xff]   ;;  %v2814_v3 = vld [vmem:[#allocation7 + $0x110] ss:$12 sps:$4 sm:$0xff]   ;;  %v2796_v4 = vld [vmem:[#allocation7 + $0xc0] ss:$12 sps:$4 sm:$0xff]  }
  0x86   :  { %415 = vmatpush1.bf16.msra.mxu0 %v2733_v17  ;;  %455 = vmatprep.subr.bf16.mxu1 %v2755_v27  ;;  %v2803_v5 = vld [vmem:[#allocation7 + $0xdc] ss:$12 sps:$4 sm:$0xff]   ;;  %v2801_v8 = vld [vmem:[#allocation7 + $0xd8] ss:$12 sps:$4 sm:$0xff]   ;;  %v2808_v9 = vld [vmem:[#allocation7 + $0xf4] ss:$12 sps:$4 sm:$0xff]  }
  0x87   :  { %416 = vmatprep.subr.bf16.mxu0 %v2734_v20  ;;  %v2815_v6 = vld [vmem:[#allocation7 + $0x50] ss:$12 sps:$4 sm:$0xff]   ;;  %v2819_v7 = vld [vmem:[#allocation7 + $0x128] ss:$12 sps:$4 sm:$0xff]   ;;  %v2824_v11 = vld [vmem:[#allocation7 + $0x140] ss:$12 sps:$4 sm:$0xff]  }
  0x88   :  { %v2820_v10 = vld [vmem:[#allocation7 + $0x68] ss:$12 sps:$4 sm:$0xff]   ;;  %v2806_v12 = vld [vmem:[#allocation7 + $0xf0] ss:$12 sps:$4 sm:$0xff]   ;;  %v2813_v13 = vld [vmem:[#allocation7 + $0x10c] ss:$12 sps:$4 sm:$0xff]  }
  0x89   :  { %456 = vmatpush1.bf16.msra.mxu1 %v2757_v29  ;;  %v2825_v14 = vld [vmem:[#allocation7 + $0x80] ss:$12 sps:$4 sm:$0xff]   ;;  %v2811_v15 = vld [vmem:[#allocation7 + $0x108] ss:$12 sps:$4 sm:$0xff]   ;;  %v2818_v16 = vld [vmem:[#allocation7 + $0x124] ss:$12 sps:$4 sm:$0xff]  }
  0x8a   :  { %417 = vmatpush1.bf16.msra.mxu0 %v2736_v21  ;;  %457 = vmatprep.subr.bf16.mxu1 %v2758_v30  ;;  %v2816_v17 = vld [vmem:[#allocation7 + $0x120] ss:$12 sps:$4 sm:$0xff]   ;;  %v2823_v18 = vld [vmem:[#allocation7 + $0x13c] ss:$12 sps:$4 sm:$0xff]   ;;  %v2821_v19 = vld [vmem:[#allocation7 + $0x138] ss:$12 sps:$4 sm:$0xff]   ;;  %v171_v30 = vlaneseq }
  0x8b   :  { %418 = vmatprep.subr.bf16.mxu0 %v2737_v24  ;;  %v2828_v20 = vld [vmem:[#allocation7 + $0x154] ss:$12 sps:$4 sm:$0xff]   ;;  %v2829_v21 = vld [vmem:[#allocation7 + $0x158] ss:$12 sps:$4 sm:$0xff]   ;;  %v2826_v22 = vld [vmem:[#allocation7 + $0x150] ss:$12 sps:$4 sm:$0xff]  }
  0x8c   :  { %v2830_v23 = vld [vmem:[#allocation7 + $0x98] ss:$12 sps:$4 sm:$0xff]   ;;  %v2831_v26 = vld [vmem:[#allocation7 + $0x168] ss:$12 sps:$4 sm:$0xff]   ;;  %v2835_v27 = vld [vmem:[#allocation7 + $0xb0] ss:$12 sps:$4 sm:$0xff]  }
  0x8d   :  { %458 = vmatpush1.bf16.msra.mxu1 %v2760_v33  ;;  %v2833_v24 = vld [vmem:[#allocation7 + $0x16c] ss:$12 sps:$4 sm:$0xff]   ;;  %v2839_v29 = vld [vmem:[#allocation7 + $0x248] ss:$12 sps:$4 sm:$0xff]   ;;  %s2283_s20 = sshll.u32 %s3209_s19, 4  ;;  %s2284_s20 = int_to_ptr.vmem [resolvable:$true] %s2283_s20 }
  0x8e   :  { %419 = vmatpush1.bf16.msra.mxu0 %v2739_v25  ;;  %459 = vmatprep.subr.bf16.mxu1 %v2761_v34  ;;  %v2834_v25 = vld [vmem:[#allocation7 + $0x170] ss:$12 sps:$4 sm:$0xff]   ;;  %v3374_v34 = vld [vmem:[%s3449_s2] sm:$0x1f]  ;;  %p3165_p7 = scmp.lt.s32.totalorder %s2284_s20, %s2284_s20 }
  0x8f   :  { %2622 = vmatprep.subr.bf16.mxu0 %v3207_v32 }
  0x91   :  { %437 = vmatmul.mubr.bf16.vlgmr.msra.gmra.mrb[0].mxu0 %v3351_v28  ;;  %460 = vmatpush1.bf16.msra.mxu1 %v2763_v36 }
  0x92   :  { %2623 = vmatpush3.bf16.msra.mxu0 %v2764_v31  ;;  %2638 = vmatprep.mubr.msk.bf16.mxu0 %vm3208_vm0, %v3207_v32  ;;  %v3366_v31 = vshrl.u32 %v171_v30, 7 }
  0x93   :  { %2624 = vmatprep.subr.bf16.mxu0 %v3207_v32  ;;  %1353 = vmatprep.subr.bf16.mxu1 %v2774_v38 }
  0x94   :  { %478 = vmatmul.mubr.bf16.vlgmr.msra.gmra.mrb[0].mxu1 %v3351_v28  ;;  %v3369_v33 = vsub.s32 0, %v3366_v31 }
  0x95   :  { %1354 = vmatpush1.bf16.msra.mxu1 %v2772_v40 }
  0x96   :  { %2625 = vmatpush3.bf16.msra.mxu0 %v2765_v35  ;;  %1355 = vmatprep.subr.bf16.mxu1 %v2777_v41  ;;  %v3377_v35 = vsub.s32 1, %v3366_v31  ;;  %v174_v36 = vrot.slane %v3374_v34, %v3369_v33 }
  0x97   :  { %2626 = vmatprep.subr.bf16.mxu0 %v3207_v32 }
  0x99   :  { %1356 = vmatpush1.bf16.msra.mxu1 %v2775_v43 }
  0x9a   :  { %2627 = vmatpush3.bf16.msra.mxu0 %v2766_v37  ;;  %1357 = vmatprep.subr.bf16.mxu1 %v2780_v44  ;;  %v178_v37 = vrot.slane %v3374_v34, %v3377_v35 }
  0x9b   :  { %2628 = vmatprep.subr.bf16.mxu0 %v3207_v32 }
  0x9d   :  { %1358 = vmatpush1.bf16.msra.mxu1 %v2778_v45 }
  0x9e   :  { %2629 = vmatpush3.bf16.msra.mxu0 %v2767_v39  ;;  %1359 = vmatprep.subr.bf16.mxu1 %v2783_v47 }
  0x9f   :  { %2630 = vmatprep.subr.bf16.mxu0 %v3207_v32 }
  0xa1   :  { %1360 = vmatpush1.bf16.msra.mxu1 %v2781_v49  ;;  %v2840_v49 = vld [vmem:[#allocation7 + $0x188] ss:$12 sps:$4 sm:$0xff]  }
  0xa2   :  { %2631 = vmatpush3.bf16.msra.mxu0 %v2768_v42  ;;  %1361 = vmatprep.subr.bf16.mxu1 %v2786_v50 }
  0xa3   :  { %2632 = vmatprep.subr.bf16.mxu0 %v3207_v32 }
  0xa5   :  { %1362 = vmatpush1.bf16.msra.mxu1 %v2784_v52  ;;  %v2844_v52 = vld [vmem:[#allocation7 + $0x260] ss:$12 sps:$4 sm:$0xff]  }
  0xa6   :  { %2633 = vmatpush3.bf16.msra.mxu0 %v2769_v46  ;;  %1363 = vmatprep.subr.bf16.mxu1 %v2789_v53  ;;  %v185_v46 = vsub.s32 3, %v3366_v31 }
  0xa7   :  { %2634 = vmatprep.subr.bf16.mxu0 %v3207_v32 }
  0xa8   :  { %v186_v53 = vrot.slane %v3374_v34, %v185_v46  ;;  %v2887_v46 = vld [vmem:[#allocation7 + $0x338] ss:$12 sps:$4 sm:$0xff]  }
  0xa9   :  { %1364 = vmatpush1.bf16.msra.mxu1 %v2787_v54  ;;  %v2841_v54 = vld [vmem:[#allocation7 + $0x198] ss:$12 sps:$4 sm:$0xff]  }
  0xaa   :  { %2635 = vmatpush3.bf16.msra.mxu0 %v2770_v48  ;;  %1365 = vmatprep.subr.bf16.mxu1 %v2792_v56  ;;  %v2836_v48 = vld [vmem:[#allocation7 + $0x180] ss:$12 sps:$4 sm:$0xff]  }
  0xab   :  { %2636 = vmatprep.subr.bf16.mxu0 %v3207_v32  ;;  %v2848_v56 = vld [vmem:[#allocation7 + $0x1b4] ss:$12 sps:$4 sm:$0xff]  }
  0xad   :  { %1366 = vmatpush1.bf16.msra.mxu1 %v2790_v59 }
  0xae   :  { %2637 = vmatpush3.bf16.msra.mxu0 %v2771_v51  ;;  %1367 = vmatprep.subr.bf16.mxu1 %v2795_v60  ;;  %v2843_v51 = vld [vmem:[#allocation7 + $0x19c] ss:$12 sps:$4 sm:$0xff]  }
  0xaf   :  { %2538 = vmatprep.subr.bf16.mxu0 %v2799_v55  ;;  %v2845_v55 = vld [vmem:[#allocation7 + $0x1a0] ss:$12 sps:$4 sm:$0xff]  }
  0xb1   :  { %2639 = vmatmul.mubr.bf16.vlgmr.msra.gmra.mrb[4].mxu0 %v3351_v28  ;;  %1368 = vmatpush1.bf16.msra.mxu1 %v2793_v63  ;;  %v2838_v28 = vld [vmem:[#allocation7 + $0x184] ss:$12 sps:$4 sm:$0xff]  }
  0xb2   :  { %2539 = vmatpush3.bf16.msra.mxu0 %v2800_v57  ;;  %1369 = vmatprep.subr.bf16.mxu1 %v2798_v1  ;;  %v2849_v57 = vld [vmem:[#allocation7 + $0x278] ss:$12 sps:$4 sm:$0xff]  }
  0xb3   :  { %2540 = vmatprep.subr.bf16.mxu0 %v2804_v58  ;;  %v2850_v63 = vld [vmem:[#allocation7 + $0x1b8] ss:$12 sps:$4 sm:$0xff]  }
  0xb5   :  { %1370 = vmatpush1.bf16.msra.mxu1 %v2796_v4 }
  0xb6   :  { %2541 = vmatpush3.bf16.msra.mxu0 %v2805_v61  ;;  %1371 = vmatprep.subr.bf16.mxu1 %v2803_v5 }
  0xb7   :  { %2542 = vmatprep.subr.bf16.mxu0 %v2809_v62  ;;  %v2846_v62 = vld [vmem:[#allocation7 + $0x1b0] ss:$12 sps:$4 sm:$0xff]  }
  0xb9   :  { %1372 = vmatpush1.bf16.msra.mxu1 %v2801_v8  ;;  %v2858_v8 = vld [vmem:[#allocation7 + $0x1e4] ss:$12 sps:$4 sm:$0xff]  }
  0xba   :  { %2543 = vmatpush3.bf16.msra.mxu0 %v2810_v2  ;;  %1373 = vmatprep.subr.bf16.mxu1 %v2808_v9  ;;  %v2853_v2 = vld [vmem:[#allocation7 + $0x1cc] ss:$12 sps:$4 sm:$0xff]   ;;  %v2859_v9 = vld [vmem:[#allocation7 + $0x2a8] ss:$12 sps:$4 sm:$0xff]  }
  0xbb   :  { %2544 = vmatprep.subr.bf16.mxu0 %v2814_v3  ;;  %v2854_v3 = vld [vmem:[#allocation7 + $0x290] ss:$12 sps:$4 sm:$0xff]  }
  0xbd   :  { %1374 = vmatpush1.bf16.msra.mxu1 %v2806_v12  ;;  %v2860_v12 = vld [vmem:[#allocation7 + $0x1e8] ss:$12 sps:$4 sm:$0xff]  }
  0xbe   :  { %2545 = vmatpush3.bf16.msra.mxu0 %v2815_v6  ;;  %1375 = vmatprep.subr.bf16.mxu1 %v2813_v13  ;;  %v2851_v6 = vld [vmem:[#allocation7 + $0x1c8] ss:$12 sps:$4 sm:$0xff]  }
  0xbf   :  { %2546 = vmatprep.subr.bf16.mxu0 %v2819_v7  ;;  %v2855_v7 = vld [vmem:[#allocation7 + $0x1d0] ss:$12 sps:$4 sm:$0xff]  }
  0xc0   :  { %v2863_v13 = vld [vmem:[#allocation7 + $0x1fc] ss:$12 sps:$4 sm:$0xff]  }
  0xc1   :  { %1376 = vmatpush1.bf16.msra.mxu1 %v2811_v15 }
  0xc2   :  { %2547 = vmatpush3.bf16.msra.mxu0 %v2820_v10  ;;  %1377 = vmatprep.subr.bf16.mxu1 %v2818_v16  ;;  %v181_v10 = vsub.s32 2, %v3366_v31  ;;  %v2861_v16 = vld [vmem:[#allocation7 + $0x1f8] ss:$12 sps:$4 sm:$0xff]  }
  0xc3   :  { %2548 = vmatprep.subr.bf16.mxu0 %v2824_v11  ;;  %v2856_v11 = vld [vmem:[#allocation7 + $0x1e0] ss:$12 sps:$4 sm:$0xff]  }
  0xc4   :  { %v182_v15 = vrot.slane %v3374_v34, %v181_v10 }
  0xc5   :  { %1378 = vmatpush1.bf16.msra.mxu1 %v2816_v17  ;;  %v2865_v17 = vld [vmem:[#allocation7 + $0x200] ss:$12 sps:$4 sm:$0xff]  }
  0xc6   :  { %2549 = vmatpush3.bf16.msra.mxu0 %v2825_v14  ;;  %1379 = vmatprep.subr.bf16.mxu1 %v2823_v18  ;;  %v2864_v14 = vld [vmem:[#allocation7 + $0x2c0] ss:$12 sps:$4 sm:$0xff]  }
  0xc7   :  { %2550 = vmatprep.subr.bf16.mxu0 %v2829_v21  ;;  %v2868_v18 = vld [vmem:[#allocation7 + $0x214] ss:$12 sps:$4 sm:$0xff]   ;;  %v2866_v21 = vld [vmem:[#allocation7 + $0x210] ss:$12 sps:$4 sm:$0xff]  }
  0xc9   :  { %1380 = vmatpush1.bf16.msra.mxu1 %v2821_v19  ;;  %v2869_v19 = vld [vmem:[#allocation7 + $0x2d8] ss:$12 sps:$4 sm:$0xff]  }
  0xca   :  { %1381 = vmatprep.subr.bf16.mxu1 %v2828_v20  ;;  %2551 = vmatpush3.bf16.msra.mxu0 %v2830_v23  ;;  %v2873_v23 = vld [vmem:[#allocation7 + $0x22c] ss:$12 sps:$4 sm:$0xff]  }
  0xcb   :  { %2552 = vmatprep.subr.bf16.mxu0 %v2834_v25 }
  0xcd   :  { %1382 = vmatpush1.bf16.msra.mxu1 %v2826_v22  ;;  %v2870_v22 = vld [vmem:[#allocation7 + $0x218] ss:$12 sps:$4 sm:$0xff]  }
  0xce   :  { %1383 = vmatprep.subr.bf16.mxu1 %v2833_v24  ;;  %2553 = vmatpush3.bf16.msra.mxu0 %v2835_v27  ;;  %v2874_v24 = vld [vmem:[#allocation7 + $0x2f0] ss:$12 sps:$4 sm:$0xff]  }
  0xcf   :  { %2560 = vmatprep.subr.bf16.mxu0 %v2839_v29  ;;  %v2875_v29 = vld [vmem:[#allocation7 + $0x230] ss:$12 sps:$4 sm:$0xff]  }
  0xd1   :  { %1384 = vmatpush1.bf16.msra.mxu1 %v2831_v26 }
  0xd2   :  { %1394 = vmatprep.subr.bf16.mxu1 %v2838_v28  ;;  %v2871_v28 = vld [vmem:[#allocation7 + $0x228] ss:$12 sps:$4 sm:$0xff]  }
 0x164   :  { %v438_v38 = vpop.f32.mrb[0].mxu0 }
 0x165   :  { %v439_v39 = vadd.f32 %v438_v38, %v174_v36  ;;  %v440_v40 = vpop.f32.mrb[1].mxu0  ;;  %v2878_v36 = vld [vmem:[#allocation7 + $0x244] ss:$12 sps:$4 sm:$0xff]  }
 0x166   :  { %v441_v41 = vadd.f32 %v440_v40, %v178_v37  ;;  %v442_v42 = vpop.f32.mrb[2].mxu0  ;;  %v2879_v40 = vld [vmem:[#allocation7 + $0x308] ss:$12 sps:$4 sm:$0xff]  }
 0x167   :  { %v526_v43 = vmax.f32 %v439_v39, 0.0  ;;  %v443_v44 = vpop.f32.mrb[3].mxu0  ;;  %v479_v58 = vpop.f32.mrb[0].mxu1  ;;  %v2876_v39 = vld [vmem:[#allocation7 + $0x240] ss:$12 sps:$4 sm:$0xff]  }
 0x168   :  { %v527_v45 = vmax.f32 %v441_v41, 0.0  ;;  %v481_v59 = vpop.f32.mrb[1].mxu1  ;;  %v480_v20 = vadd.f32 %v479_v58, %v182_v15  ;;  %v2882_v41 = vld [vmem:[#allocation7 + $0x25c] ss:$12 sps:$4 sm:$0xff]   ;;  %v2880_v42 = vld [vmem:[#allocation7 + $0x258] ss:$12 sps:$4 sm:$0xff]  }
 0x169   :  { %v531_v50 = vpack.c.bf16 %v526_v43, %v526_v43  ;;  %v482_v60 = vadd.f32 %v481_v59, %v186_v53  ;;  %v483_v61 = vpop.f32.mrb[2].mxu1  ;;  %v2883_v43 = vld [vmem:[#allocation7 + $0x320] ss:$12 sps:$4 sm:$0xff]   ;;  %v2895_v53 = vld [vmem:[#allocation7 + $0x368] ss:$12 sps:$4 sm:$0xff]  }
 0x16a   :  { %v532_v47 = vpack.c.bf16 %v527_v45, %v527_v45  ;;  %v484_v1 = vpop.f32.mrb[3].mxu1  ;;  %v528_v26 = vmax.f32 %v480_v20, 0.0  ;;  %v2886_v44 = vld [vmem:[#allocation7 + $0x274] ss:$12 sps:$4 sm:$0xff]   ;;  %v2884_v45 = vld [vmem:[#allocation7 + $0x270] ss:$12 sps:$4 sm:$0xff]  }
 0x16b   :  { %v529_v4 = vmax.f32 %v482_v60, 0.0  ;;  %v2902_v58 = vld [vmem:[#allocation7 + $0x2d4] ss:$12 sps:$4 sm:$0xff]   ;;  %v2900_v60 = vld [vmem:[#allocation7 + $0x2d0] ss:$12 sps:$4 sm:$0xff]  }
 0x16c   :  { %1385 = vmatprep.mubr.bf16.mxu1 %v532_v47  ;;  %1508 = vmatprep.mubr.bf16.mxu0 %v532_v47  ;;  %v3389_v38 = vpack.c.bf16 %v528_v26, %v528_v26  ;;  %v2890_v47 = vld [vmem:[#allocation7 + $0x28c] ss:$12 sps:$4 sm:$0xff]   ;;  %v2907_v1 = vld [vmem:[#allocation7 + $0x3b0] ss:$12 sps:$4 sm:$0xff]   ;;  %v2932_v20 = vld [vmem:[#allocation8] ss:$8 sps:$4 sm:$0xff]  }
 0x16d   :  { %1386 = vmatmul.mubr.bf16.vlgmr.msra.gmra.mrb[4].mxu1 %v531_v50  ;;  %1509 = vmatmul.mubr.bf16.vlgmr.msra.gmra.mrb[8].mxu0 %v531_v50  ;;  %v534_v5 = vpack.c.bf16 %v529_v4, %v529_v4  ;;  %v2894_v50 = vld [vmem:[#allocation7 + $0x2a4] ss:$12 sps:$4 sm:$0xff]   ;;  %v2908_v4 = vld [vmem:[#allocation7 + $0x300] ss:$12 sps:$4 sm:$0xff]   ;;  %v2943_v26 = vld [vmem:[#allocation8 + $0x34] ss:$8 sps:$4 sm:$0xff]  }
 0x16e   :  { %1395 = vmatpush1.bf16.msra.mxu1 %v2836_v48  ;;  %2561 = vmatpush3.bf16.msra.mxu0 %v2840_v49  ;;  %v2888_v48 = vld [vmem:[#allocation7 + $0x288] ss:$12 sps:$4 sm:$0xff]   ;;  %v2891_v49 = vld [vmem:[#allocation7 + $0x350] ss:$12 sps:$4 sm:$0xff]   ;;  %v2903_v61 = vld [vmem:[#allocation7 + $0x398] ss:$12 sps:$4 sm:$0xff]  }
 0x16f   :  { %1396 = vmatprep.subr.bf16.mxu1 %v2843_v51  ;;  %2562 = vmatprep.subr.bf16.mxu0 %v2844_v52  ;;  %v189_v51 = vsub.s32 4, %v3366_v31  ;;  %v2892_v52 = vld [vmem:[#allocation7 + $0x2a0] ss:$12 sps:$4 sm:$0xff]   ;;  %v2923_v15 = vld [vmem:[#allocation7 + $0x378] ss:$12 sps:$4 sm:$0xff]  }
 0x170   :  { %1548 = vmatprep.mubr.bf16.mxu0 %v534_v5  ;;  %1426 = vmatprep.mubr.bf16.mxu1 %v534_v5  ;;  %v2913_v5 = vld [vmem:[#allocation7 + $0x31c] ss:$12 sps:$4 sm:$0xff]  }
 0x172   :  { %1397 = vmatpush1.bf16.msra.mxu1 %v2841_v54  ;;  %2563 = vmatpush3.bf16.msra.mxu0 %v2845_v55  ;;  %v2898_v54 = vld [vmem:[#allocation7 + $0x2bc] ss:$12 sps:$4 sm:$0xff]   ;;  %v190_v55 = vrot.slane %v3374_v34, %v189_v51 }
 0x173   :  { %1398 = vmatprep.subr.bf16.mxu1 %v2848_v56  ;;  %2564 = vmatprep.subr.bf16.mxu0 %v2849_v57  ;;  %v2896_v56 = vld [vmem:[#allocation7 + $0x2b8] ss:$12 sps:$4 sm:$0xff]   ;;  %v2899_v57 = vld [vmem:[#allocation7 + $0x380] ss:$12 sps:$4 sm:$0xff]   ;;  %v2904_v34 = vld [vmem:[#allocation7 + $0x2e8] ss:$12 sps:$4 sm:$0xff]  }
 0x174   :  { %v2973_v51 = vld [vmem:[#allocation8 + $0xd4] ss:$8 sps:$4 sm:$0xff]  }
 0x176   :  { %1399 = vmatpush1.bf16.msra.mxu1 %v2846_v62  ;;  %2565 = vmatpush3.bf16.msra.mxu0 %v2850_v63  ;;  %v2906_v62 = vld [vmem:[#allocation7 + $0x2ec] ss:$12 sps:$4 sm:$0xff]  }
 0x177   :  { %1400 = vmatprep.subr.bf16.mxu1 %v2853_v2  ;;  %2566 = vmatprep.subr.bf16.mxu0 %v2854_v3  ;;  %v2910_v2 = vld [vmem:[#allocation7 + $0x304] ss:$12 sps:$4 sm:$0xff]  }
 0x17a   :  { %1401 = vmatpush1.bf16.msra.mxu1 %v2851_v6  ;;  %2567 = vmatpush3.bf16.msra.mxu0 %v2855_v7  ;;  %v2911_v6 = vld [vmem:[#allocation7 + $0x318] ss:$12 sps:$4 sm:$0xff]   ;;  %v2916_v7 = vld [vmem:[#allocation7 + $0x334] ss:$12 sps:$4 sm:$0xff]  }
 0x17b   :  { %1402 = vmatprep.subr.bf16.mxu1 %v2858_v8  ;;  %2568 = vmatprep.subr.bf16.mxu0 %v2859_v9  ;;  %v2914_v8 = vld [vmem:[#allocation7 + $0x330] ss:$12 sps:$4 sm:$0xff]   ;;  %v2919_v9 = vld [vmem:[#allocation7 + $0x34c] ss:$12 sps:$4 sm:$0xff]  }
 0x17e   :  { %1403 = vmatpush1.bf16.msra.mxu1 %v2856_v11  ;;  %2569 = vmatpush3.bf16.msra.mxu0 %v2860_v12  ;;  %v2917_v11 = vld [vmem:[#allocation7 + $0x348] ss:$12 sps:$4 sm:$0xff]   ;;  %v2922_v12 = vld [vmem:[#allocation7 + $0x364] ss:$12 sps:$4 sm:$0xff]  }
 0x17f   :  { %1404 = vmatprep.subr.bf16.mxu1 %v2863_v13  ;;  %2570 = vmatprep.subr.bf16.mxu0 %v2864_v14  ;;  %v2920_v13 = vld [vmem:[#allocation7 + $0x360] ss:$12 sps:$4 sm:$0xff]   ;;  %v2925_v14 = vld [vmem:[#allocation7 + $0x37c] ss:$12 sps:$4 sm:$0xff]  }
 0x182   :  { %1405 = vmatpush1.bf16.msra.mxu1 %v2861_v16  ;;  %2571 = vmatpush3.bf16.msra.mxu0 %v2865_v17  ;;  %v2928_v16 = vld [vmem:[#allocation7 + $0x394] ss:$12 sps:$4 sm:$0xff]   ;;  %v2926_v17 = vld [vmem:[#allocation7 + $0x390] ss:$12 sps:$4 sm:$0xff]  }
 0x183   :  { %1406 = vmatprep.subr.bf16.mxu1 %v2868_v18  ;;  %2572 = vmatprep.subr.bf16.mxu0 %v2869_v19  ;;  %v2931_v18 = vld [vmem:[#allocation7 + $0x3ac] ss:$12 sps:$4 sm:$0xff]   ;;  %v2929_v19 = vld [vmem:[#allocation7 + $0x3a8] ss:$12 sps:$4 sm:$0xff]  }
 0x184   :  { %v520_v25 = vpop.f32.mrb[4].mxu0 }
 0x185   :  { %v2640_v27 = vpop.f32.mrb[5].mxu0  ;;  %v521_v59 = vadd.f32 %v520_v25, %v190_v55  ;;  %v2938_v25 = vld [vmem:[#allocation8 + $0x20] ss:$8 sps:$4 sm:$0xff]   ;;  %v2979_v55 = vld [vmem:[#allocation8 + $0xf4] ss:$8 sps:$4 sm:$0xff]  }
 0x186   :  { %1407 = vmatpush1.bf16.msra.mxu1 %v2866_v21  ;;  %2573 = vmatpush3.bf16.msra.mxu0 %v2870_v22  ;;  %v523_v30 = vpop.f32.mrb[6].mxu0  ;;  %v2934_v21 = vld [vmem:[#allocation8 + $0x4] ss:$8 sps:$4 sm:$0xff]   ;;  %v2937_v22 = vld [vmem:[#allocation8 + $0x14] ss:$8 sps:$4 sm:$0xff]  }
 0x187   :  { %1408 = vmatprep.subr.bf16.mxu1 %v2873_v23  ;;  %2574 = vmatprep.subr.bf16.mxu0 %v2874_v24  ;;  %v2641_v37 = vpop.f32.mrb[7].mxu0  ;;  %v530_v63 = vmax.f32 %v521_v59, 0.0  ;;  %v2935_v23 = vld [vmem:[#allocation8 + $0x10] ss:$8 sps:$4 sm:$0xff]   ;;  %v2940_v24 = vld [vmem:[#allocation8 + $0x24] ss:$8 sps:$4 sm:$0xff]  }
 0x188   :  { %v2941_v27 = vld [vmem:[#allocation8 + $0x30] ss:$8 sps:$4 sm:$0xff]   ;;  %v2949_v30 = vld [vmem:[#allocation8 + $0x54] ss:$8 sps:$4 sm:$0xff]   ;;  %v2952_v37 = vld [vmem:[#allocation8 + $0x64] ss:$8 sps:$4 sm:$0xff]  }
 0x189   :  { %v535_v3 = vpack.c.bf16 %v530_v63, %v530_v63  ;;  %v3004_v63 = vld [vmem:[#allocation10 + $0x40] sm:$0xff]  }
 0x18a   :  { %1409 = vmatpush1.bf16.msra.mxu1 %v2871_v28  ;;  %2575 = vmatpush3.bf16.msra.mxu0 %v2875_v29  ;;  %v2946_v28 = vld [vmem:[#allocation8 + $0x44] ss:$8 sps:$4 sm:$0xff]   ;;  %v2944_v29 = vld [vmem:[#allocation8 + $0x40] ss:$8 sps:$4 sm:$0xff]  }
 0x18b   :  { %1410 = vmatprep.subr.bf16.mxu1 %v2878_v36  ;;  %2642 = vmatprep.subr.bf16.mxu0 %v3207_v32  ;;  %v2947_v36 = vld [vmem:[#allocation8 + $0x50] ss:$8 sps:$4 sm:$0xff]  }
 0x18d   :  { %1549 = vmatmul.mubr.bf16.vlgmr.msra.gmra.mrb[12].mxu0 %v3389_v38 }
 0x18e   :  { %1411 = vmatpush1.bf16.msra.mxu1 %v2876_v39  ;;  %2643 = vmatpush3.bf16.msra.mxu0 %v2879_v40  ;;  %v2955_v39 = vld [vmem:[#allocation8 + $0x74] ss:$8 sps:$4 sm:$0xff]   ;;  %v2953_v40 = vld [vmem:[#allocation8 + $0x70] ss:$8 sps:$4 sm:$0xff]  }
 0x18f   :  { %1412 = vmatprep.subr.bf16.mxu1 %v2882_v41  ;;  %2644 = vmatprep.subr.bf16.mxu0 %v3207_v32  ;;  %v2956_v41 = vld [vmem:[#allocation8 + $0x80] ss:$8 sps:$4 sm:$0xff]  }
 0x190   :  { %2658 = vmatprep.mubr.msk.bf16.mxu0 %vm3208_vm0, %v3207_v32 }
 0x192   :  { %1413 = vmatpush1.bf16.msra.mxu1 %v2880_v42  ;;  %2645 = vmatpush3.bf16.msra.mxu0 %v2883_v43  ;;  %v2958_v42 = vld [vmem:[#allocation8 + $0x84] ss:$8 sps:$4 sm:$0xff]   ;;  %v2961_v43 = vld [vmem:[#allocation8 + $0x94] ss:$8 sps:$4 sm:$0xff]  }
 0x193   :  { %1414 = vmatprep.subr.bf16.mxu1 %v2886_v44  ;;  %2646 = vmatprep.subr.bf16.mxu0 %v3207_v32  ;;  %v2959_v44 = vld [vmem:[#allocation8 + $0x90] ss:$8 sps:$4 sm:$0xff]  }
 0x196   :  { %1415 = vmatpush1.bf16.msra.mxu1 %v2884_v45  ;;  %2647 = vmatpush3.bf16.msra.mxu0 %v2887_v46  ;;  %v2964_v45 = vld [vmem:[#allocation8 + $0xa4] ss:$8 sps:$4 sm:$0xff]   ;;  %v2962_v46 = vld [vmem:[#allocation8 + $0xa0] ss:$8 sps:$4 sm:$0xff]  }
 0x197   :  { %1416 = vmatprep.subr.bf16.mxu1 %v2890_v47  ;;  %2648 = vmatprep.subr.bf16.mxu0 %v3207_v32  ;;  %v2967_v47 = vld [vmem:[#allocation8 + $0xb4] ss:$8 sps:$4 sm:$0xff]  }
 0x19a   :  { %1417 = vmatpush1.bf16.msra.mxu1 %v2888_v48  ;;  %2649 = vmatpush3.bf16.msra.mxu0 %v2891_v49  ;;  %v2965_v48 = vld [vmem:[#allocation8 + $0xb0] ss:$8 sps:$4 sm:$0xff]   ;;  %v2970_v49 = vld [vmem:[#allocation8 + $0xc4] ss:$8 sps:$4 sm:$0xff]  }
 0x19b   :  { %1418 = vmatprep.subr.bf16.mxu1 %v2894_v50  ;;  %2650 = vmatprep.subr.bf16.mxu0 %v3207_v32  ;;  %v2968_v50 = vld [vmem:[#allocation8 + $0xc0] ss:$8 sps:$4 sm:$0xff]  }
 0x19e   :  { %1419 = vmatpush1.bf16.msra.mxu1 %v2892_v52  ;;  %2651 = vmatpush3.bf16.msra.mxu0 %v2895_v53  ;;  %v2971_v52 = vld [vmem:[#allocation8 + $0xd0] ss:$8 sps:$4 sm:$0xff]   ;;  %v2976_v53 = vld [vmem:[#allocation8 + $0xe4] ss:$8 sps:$4 sm:$0xff]  }
 0x19f   :  { %1420 = vmatprep.subr.bf16.mxu1 %v2898_v54  ;;  %2652 = vmatprep.subr.bf16.mxu0 %v3207_v32  ;;  %v2974_v54 = vld [vmem:[#allocation8 + $0xe0] ss:$8 sps:$4 sm:$0xff]  }
 0x1a2   :  { %1421 = vmatpush1.bf16.msra.mxu1 %v2896_v56  ;;  %2653 = vmatpush3.bf16.msra.mxu0 %v2899_v57  ;;  %v2977_v56 = vld [vmem:[#allocation8 + $0xf0] ss:$8 sps:$4 sm:$0xff]   ;;  %v2982_v57 = vld [vmem:[#allocation8 + $0x104] ss:$8 sps:$4 sm:$0xff]  }
 0x1a3   :  { %1422 = vmatprep.subr.bf16.mxu1 %v2902_v58  ;;  %2654 = vmatprep.subr.bf16.mxu0 %v3207_v32 }
 0x1a6   :  { %1423 = vmatpush1.bf16.msra.mxu1 %v2900_v60  ;;  %2655 = vmatpush3.bf16.msra.mxu0 %v2903_v61 }
 0x1a7   :  { %1424 = vmatprep.subr.bf16.mxu1 %v2906_v62  ;;  %2656 = vmatprep.subr.bf16.mxu0 %v3207_v32 }
 0x1aa   :  { %1425 = vmatpush1.bf16.msra.mxu1 %v2904_v34  ;;  %2657 = vmatpush3.bf16.msra.mxu0 %v2907_v1  ;;  %v3005_v34 = vld [vmem:[#allocation10] sm:$0xff]   ;;  %v3006_v1 = vld [vmem:[#allocation10 + $0x48] sm:$0xff]  }
 0x1ab   :  { %1435 = vmatprep.subr.bf16.mxu1 %v2910_v2  ;;  %1902 = vmatprep.subr.bf16.mxu0 %v2934_v21  ;;  %v3007_v2 = vld [vmem:[#allocation10 + $0x8] sm:$0xff]  }
 0x1ad   :  { %1427 = vmatmul.mubr.bf16.vlgmr.msra.gmra.mrb[4].mxu1 %v3389_v38  ;;  %2659 = vmatmul.mubr.bf16.vlgmr.msra.gmra.mrb[16].mxu0 %v535_v3  ;;  %v2950_v38 = vld [vmem:[#allocation8 + $0x60] ss:$8 sps:$4 sm:$0xff]  }
 0x1ae   :  { %1436 = vmatpush1.bf16.msra.mxu1 %v2908_v4  ;;  %1467 = vmatprep.mubr.bf16.mxu1 %v3206_v0  ;;  %v3009_v4 = vld [vmem:[#allocation10 + $0x10] sm:$0xff]  }
 0x1af   :  { %1437 = vmatprep.subr.bf16.mxu1 %v2913_v5  ;;  %1903 = vmatpush1.bf16.msra.mxu0 %v2932_v20  ;;  %v3010_v5 = vld [vmem:[#allocation10 + $0x58] sm:$0xff]  }
 0x1b0   :  { %1904 = vmatprep.subr.bf16.mxu0 %v2937_v22 }
 0x1b2   :  { %1438 = vmatpush1.bf16.msra.mxu1 %v2911_v6  ;;  %v3011_v6 = vld [vmem:[#allocation10 + $0x18] sm:$0xff]  }
 0x1b3   :  { %1439 = vmatprep.subr.bf16.mxu1 %v2916_v7  ;;  %1905 = vmatpush1.bf16.msra.mxu0 %v2935_v23  ;;  %v3012_v7 = vld [vmem:[#allocation10 + $0x60] sm:$0xff]  }
 0x1b4   :  { %1906 = vmatprep.subr.bf16.mxu0 %v2940_v24 }
 0x1b6   :  { %1440 = vmatpush1.bf16.msra.mxu1 %v2914_v8  ;;  %v3013_v8 = vld [vmem:[#allocation10 + $0x20] sm:$0xff]  }
 0x1b7   :  { %1441 = vmatprep.subr.bf16.mxu1 %v2919_v9  ;;  %1907 = vmatpush1.bf16.msra.mxu0 %v2938_v25  ;;  %v3014_v9 = vld [vmem:[#allocation10 + $0x68] sm:$0xff]  }
 0x1b8   :  { %1908 = vmatprep.subr.bf16.mxu0 %v2943_v26 }
 0x1ba   :  { %1442 = vmatpush1.bf16.msra.mxu1 %v2917_v11  ;;  %v696_v11 = vld [vmem:[%s3451_s4] sm:$0x7] }
 0x1bb   :  { %1443 = vmatprep.subr.bf16.mxu1 %v2922_v12  ;;  %1909 = vmatpush1.bf16.msra.mxu0 %v2941_v27  ;;  %v3015_v12 = vld [vmem:[#allocation10 + $0x28] sm:$0xff]   ;;  %v701_v26 = vrot.slane %v696_v11, %v3369_v33  ;;  %v705_v27 = vrot.slane %v696_v11, %v3377_v35 }
 0x1bc   :  { %1910 = vmatprep.subr.bf16.mxu0 %v2946_v28 }
 0x1be   :  { %1444 = vmatpush1.bf16.msra.mxu1 %v2920_v13  ;;  %v709_v13 = vrot.slane %v696_v11, %v181_v10 }
 0x1bf   :  { %1445 = vmatprep.subr.bf16.mxu1 %v2925_v14  ;;  %1911 = vmatpush1.bf16.msra.mxu0 %v2944_v29 }
 0x1c0   :  { %1912 = vmatprep.subr.bf16.mxu0 %v2949_v30 }
 0x1c2   :  { %1446 = vmatpush1.bf16.msra.mxu1 %v2923_v15 }
 0x1c3   :  { %1447 = vmatprep.subr.bf16.mxu1 %v2928_v16  ;;  %1913 = vmatpush1.bf16.msra.mxu0 %v2947_v36 }
 0x1c4   :  { %1914 = vmatprep.subr.bf16.mxu0 %v2952_v37 }
 0x1c6   :  { %1448 = vmatpush1.bf16.msra.mxu1 %v2926_v17 }
 0x1c7   :  { %1449 = vmatprep.subr.bf16.mxu1 %v2931_v18  ;;  %1915 = vmatpush1.bf16.msra.mxu0 %v2950_v38 }
 0x1c8   :  { %1916 = vmatprep.subr.bf16.mxu0 %v2955_v39 }
 0x1ca   :  { %1450 = vmatpush1.bf16.msra.mxu1 %v2929_v19 }
 0x1cb   :  { %1917 = vmatpush1.bf16.msra.mxu0 %v2953_v40  ;;  %2591 = vmatprep.subr.bf16.mxu1 %v3004_v63  ;;  %v2980_v40 = vld [vmem:[#allocation8 + $0x100] ss:$8 sps:$4 sm:$0xff]  }
 0x1cc   :  { %1918 = vmatprep.subr.bf16.mxu0 %v2958_v42  ;;  %v2985_v42 = vld [vmem:[#allocation8 + $0x114] ss:$8 sps:$4 sm:$0xff]  }
 0x1cd   :  { %1468 = vmatmul.mubr.bf16.vlgmr.msra.gmra.mrb[4].mxu1 %v535_v3  ;;  %v3008_v3 = vld [vmem:[#allocation10 + $0x50] sm:$0xff]  }
 0x1ce   :  { %2592 = vmatpush3.bf16.msra.mxu1 %v3005_v34 }
 0x1cf   :  { %1919 = vmatpush1.bf16.msra.mxu0 %v2956_v41  ;;  %2593 = vmatprep.subr.bf16.mxu1 %v3006_v1 }
 0x1d0   :  { %1920 = vmatprep.subr.bf16.mxu0 %v2961_v43  ;;  %v2983_v43 = vld [vmem:[#allocation8 + $0x110] ss:$8 sps:$4 sm:$0xff]  }
 0x1d2   :  { %2594 = vmatpush3.bf16.msra.mxu1 %v3007_v2 }
 0x1d3   :  { %1921 = vmatpush1.bf16.msra.mxu0 %v2959_v44  ;;  %2595 = vmatprep.subr.bf16.mxu1 %v3008_v3  ;;  %v2988_v44 = vld [vmem:[#allocation8 + $0x124] ss:$8 sps:$4 sm:$0xff]  }
 0x1d4   :  { %1922 = vmatprep.subr.bf16.mxu0 %v2964_v45  ;;  %v2986_v45 = vld [vmem:[#allocation8 + $0x120] ss:$8 sps:$4 sm:$0xff]  }
 0x1d6   :  { %2596 = vmatpush3.bf16.msra.mxu1 %v3009_v4 }
 0x1d7   :  { %1923 = vmatpush1.bf16.msra.mxu0 %v2962_v46  ;;  %2597 = vmatprep.subr.bf16.mxu1 %v3010_v5  ;;  %v2991_v46 = vld [vmem:[#allocation8 + $0x134] ss:$8 sps:$4 sm:$0xff]  }
 0x1d8   :  { %1924 = vmatprep.subr.bf16.mxu0 %v2967_v47  ;;  %v2989_v47 = vld [vmem:[#allocation8 + $0x130] ss:$8 sps:$4 sm:$0xff]  }
 0x1da   :  { %2598 = vmatpush3.bf16.msra.mxu1 %v3011_v6 }
 0x1db   :  { %1925 = vmatpush1.bf16.msra.mxu0 %v2965_v48  ;;  %2599 = vmatprep.subr.bf16.mxu1 %v3012_v7  ;;  %v2994_v48 = vld [vmem:[#allocation8 + $0x144] ss:$8 sps:$4 sm:$0xff]  }
 0x1dc   :  { %1926 = vmatprep.subr.bf16.mxu0 %v2970_v49  ;;  %v2992_v49 = vld [vmem:[#allocation8 + $0x140] ss:$8 sps:$4 sm:$0xff]  }
 0x1de   :  { %2600 = vmatpush3.bf16.msra.mxu1 %v3013_v8 }
 0x1df   :  { %1927 = vmatpush1.bf16.msra.mxu0 %v2968_v50  ;;  %2601 = vmatprep.subr.bf16.mxu1 %v3014_v9  ;;  %v2997_v50 = vld [vmem:[#allocation8 + $0x154] ss:$8 sps:$4 sm:$0xff]   ;;  %v3020_v9 = vld [vmem:[#allocation11] sm:$0xff]  }
 0x1e0   :  { %1928 = vmatprep.subr.bf16.mxu0 %v2973_v51  ;;  %v2995_v51 = vld [vmem:[#allocation8 + $0x150] ss:$8 sps:$4 sm:$0xff]  }
 0x1e2   :  { %2602 = vmatpush3.bf16.msra.mxu1 %v3015_v12  ;;  %v3021_v12 = vld [vmem:[#allocation11 + $0x8] sm:$0xff]  }
 0x1e3   :  { %1929 = vmatpush1.bf16.msra.mxu0 %v2971_v52  ;;  %v3000_v52 = vld [vmem:[#allocation8 + $0x164] ss:$8 sps:$4 sm:$0xff]  }
 0x1e4   :  { %1930 = vmatprep.subr.bf16.mxu0 %v2976_v53  ;;  %v3003_v53 = vld [vmem:[#allocation8 + $0x174] ss:$8 sps:$4 sm:$0xff]  }
 0x1e7   :  { %1931 = vmatpush1.bf16.msra.mxu0 %v2974_v54  ;;  %v3001_v54 = vld [vmem:[#allocation8 + $0x170] ss:$8 sps:$4 sm:$0xff]  }
 0x1e8   :  { %1932 = vmatprep.subr.bf16.mxu0 %v2979_v55 }
 0x1eb   :  { %1933 = vmatpush1.bf16.msra.mxu0 %v2977_v56 }
 0x1ec   :  { %1943 = vmatprep.subr.bf16.mxu0 %v2982_v57  ;;  %v3016_v57 = vld [vmem:[#allocation10 + $0x70] sm:$0xff]  }
 0x1ed   :  { %2603 = vmatprep.subr.bf16.mxu1 %v3016_v57 }
 0x240   :  { %v2554_v58 = vpop.f32.mrb[8].mxu0 }
 0x241   :  { %v2555_v59 = vpop.f32.mrb[9].mxu0 }
 0x242   :  { %v2556_v60 = vadd.f32 %v2555_v59, %v2554_v58  ;;  %v2557_v61 = vpop.f32.mrb[10].mxu0  ;;  %v3017_v58 = vld [vmem:[#allocation10 + $0x30] sm:$0xff]   ;;  %v3018_v59 = vld [vmem:[#allocation10 + $0x78] sm:$0xff]  }
 0x243   :  { %v2558_v62 = vpop.f32.mrb[11].mxu0  ;;  %2604 = vmatpush3.bf16.msra.mxu1 %v3017_v58  ;;  %v1650_v61 = vld [vmem:[%s3453_s6] sm:$0x3] }
 0x244   :  { %v1511_v16 = vadd.f32 %v2556_v60, %v709_v13  ;;  %v3019_v60 = vld [vmem:[#allocation10 + $0x38] sm:$0xff]   ;;  %2605 = vmatprep.subr.bf16.mxu1 %v3018_v59  ;;  %v1655_v62 = vrot.slane %v1650_v61, %v3369_v33  ;;  %v1659_v63 = vrot.slane %v1650_v61, %v3377_v35  ;;  %v3022_v33 = vld [vmem:[#allocation11 + $0x10] sm:$0xff]   ;;  %v3024_v13 = vld [vmem:[#allocation11 + $0x20] sm:$0xff]  }
 0x245   :  { %v3023_v35 = vld [vmem:[#allocation11 + $0x18] sm:$0xff]  }
 0x247   :  { %2606 = vmatpush3.bf16.msra.mxu1 %v3019_v60 }
 0x248   :  { %2662 = vmatprep.subr.bf16.mxu1 %v3207_v32 }
 0x260   :  { %v2576_v14 = vpop.f32.mrb[12].mxu0 }
 0x261   :  { %v2577_v15 = vpop.f32.mrb[13].mxu0 }
 0x262   :  { %v2578_v17 = vadd.f32 %v2577_v15, %v2576_v14  ;;  %v2579_v18 = vpop.f32.mrb[14].mxu0  ;;  %v3025_v14 = vld [vmem:[#allocation11 + $0x28] sm:$0xff]   ;;  %v3026_v15 = vld [vmem:[#allocation11 + $0x30] sm:$0xff]  }
 0x263   :  { %v2580_v19 = vpop.f32.mrb[15].mxu0  ;;  %v2503_v18 = vld [vmem:[%s3455_s8] ss:$0 sm:$0xff]  ;;  %s3160_s8 = scalar_lea.vmem %s2284_s20, 128 }
 0x264   :  { %v1551_v20 = vadd.f32 %v2578_v17, %v1511_v16  ;;  %v3027_v16 = vld [vmem:[#allocation11 + $0x38] sm:$0xff]   ;;  %p3161_p6 = scmp.ne.s32.totalorder %s2284_s20, %s3160_s8  ;;  %p3166_p8 = scmp.lt.s32.totalorder %s3160_s8, %s3160_s8 }
 0x266   :  { %p3167_p9 = por %p3166_p8, %p3165_p7 }
 0x268   :  { %p3168_p10 = pnand %p3167_p9, %p3161_p6 }
 0x280   :  { %v1590_v21 = vpop.f32.mrb[16].mxu0 }
 0x281   :  { %v1591_v22 = vadd.f32 %v1590_v21, %v1551_v20  ;;  %v2660_v23 = vpop.f32.mrb[17].mxu0 }
 0x282   :  { %v1593_v24 = vpop.f32.mrb[18].mxu0 }
 0x283   :  { %v2661_v25 = vpop.f32.mrb[19].mxu0  ;;  %v1598_v55 = vmax.f32 %v1591_v22, 0.0 }
 0x285   :  { %v1601_v56 = vpack.c.bf16 %v1598_v55, %v1598_v55 }
 0x2a0   :  { %v1469_v28 = vpop.f32.mrb[4].mxu1 }
 0x2a1   :  { %v2682_v31 = vadd.f32 %v1469_v28, %v701_v26  ;;  %v1471_v10 = vpop.f32.mrb[5].mxu1  ;;  %v2520_v26 = vld [vmem:[%s3457_s10] ss:$0 sm:$0xff] }
 0x2a2   :  { %v2683_v29 = vadd.f32 %v1471_v10, %v705_v27  ;;  %v1473_v30 = vpop.f32.mrb[6].mxu1 }
 0x2a3   :  { %v1596_v36 = vmax.f32 %v2682_v31, 0.0  ;;  %v1474_v37 = vpop.f32.mrb[7].mxu1 }
 0x2a4   :  { %v1597_v38 = vmax.f32 %v2683_v29, 0.0 }
 0x2a5   :  { %v1599_v41 = vpack.c.bf16 %v1596_v36, %v1596_v36 }
 0x2a6   :  { %v1600_v39 = vpack.c.bf16 %v1597_v38, %v1597_v38 }
 0x2a8   :  { %1934 = vmatprep.mubr.bf16.mxu0 %v1600_v39 }
 0x2a9   :  { %1935 = vmatmul.mubr.bf16.vlgmr.msra.gmra.mrb[20].mxu0 %v1599_v41 }
 0x2aa   :  { %1944 = vmatpush1.bf16.msra.mxu0 %v2980_v40  ;;  %1975 = vmatprep.mubr.bf16.mxu0 %v3206_v0  ;;  %v2998_v0 = vld [vmem:[#allocation8 + $0x160] ss:$8 sps:$4 sm:$0xff]  }
 0x2ab   :  { %1945 = vmatprep.subr.bf16.mxu0 %v2985_v42 }
 0x2ae   :  { %1946 = vmatpush1.bf16.msra.mxu0 %v2983_v43 }
 0x2af   :  { %1947 = vmatprep.subr.bf16.mxu0 %v2988_v44 }
 0x2b2   :  { %1948 = vmatpush1.bf16.msra.mxu0 %v2986_v45 }
 0x2b3   :  { %1949 = vmatprep.subr.bf16.mxu0 %v2991_v46 }
 0x2b6   :  { %1950 = vmatpush1.bf16.msra.mxu0 %v2989_v47 }
 0x2b7   :  { %1951 = vmatprep.subr.bf16.mxu0 %v2994_v48 }
 0x2ba   :  { %1952 = vmatpush1.bf16.msra.mxu0 %v2992_v49 }
 0x2bb   :  { %1953 = vmatprep.subr.bf16.mxu0 %v2997_v50 }
 0x2be   :  { %1954 = vmatpush1.bf16.msra.mxu0 %v2995_v51 }
 0x2bf   :  { %1955 = vmatprep.subr.bf16.mxu0 %v3000_v52 }
 0x2c2   :  { %1956 = vmatpush1.bf16.msra.mxu0 %v2998_v0 }
 0x2c3   :  { %1957 = vmatprep.subr.bf16.mxu0 %v3003_v53 }
 0x2c6   :  { %1958 = vmatpush1.bf16.msra.mxu0 %v3001_v54 }
 0x2c9   :  { %1976 = vmatmul.mubr.bf16.vlgmr.msra.gmra.mrb[20].mxu0 %v1601_v56 }
 0x39c   :  { %v1977_v34 = vpop.f32.mrb[20].mxu0 }
 0x39d   :  { %v2684_v1 = vadd.f32 %v1977_v34, %v1655_v62  ;;  %v1979_v2 = vpop.f32.mrb[21].mxu0 }
 0x39e   :  { %v2685_v3 = vadd.f32 %v1979_v2, %v1659_v63  ;;  %v1981_v4 = vpop.f32.mrb[22].mxu0 }
 0x39f   :  { %v1984_v5 = vmax.f32 %v2684_v1, 0.0  ;;  %v1982_v6 = vpop.f32.mrb[23].mxu0 }
 0x3a0   :  { %v1985_v7 = vmax.f32 %v2685_v3, 0.0 }
 0x3a1   :  { %v1986_v11 = vpack.c.bf16 %v1984_v5, %v1984_v5 }
 0x3a2   :  { %v1987_v8 = vpack.c.bf16 %v1985_v7, %v1985_v7 }
 0x3a4   :  { %2155 = vmatprep.mubr.bf16.mxu1 %v1987_v8 }
 0x3a5   :  { %2156 = vmatmul.mubr.bf16.vlgmr.msra.gmra.mrb[8].mxu1 %v1986_v11 }
 0x3a6   :  { %2663 = vmatpush3.bf16.msra.mxu1 %v3020_v9  ;;  %2678 = vmatprep.mubr.msk.bf16.mxu1 %vm3208_vm0, %v3207_v32 }
 0x3a7   :  { %2664 = vmatprep.subr.bf16.mxu1 %v3207_v32 }
 0x3aa   :  { %2665 = vmatpush3.bf16.msra.mxu1 %v3021_v12 }
 0x3ab   :  { %2666 = vmatprep.subr.bf16.mxu1 %v3207_v32 }
 0x3ae   :  { %2667 = vmatpush3.bf16.msra.mxu1 %v3022_v33 }
 0x3af   :  { %2668 = vmatprep.subr.bf16.mxu1 %v3207_v32 }
 0x3b2   :  { %2669 = vmatpush3.bf16.msra.mxu1 %v3023_v35 }
 0x3b3   :  { %2670 = vmatprep.subr.bf16.mxu1 %v3207_v32 }
 0x3b6   :  { %2671 = vmatpush3.bf16.msra.mxu1 %v3024_v13 }
 0x3b7   :  { %2672 = vmatprep.subr.bf16.mxu1 %v3207_v32 }
 0x3ba   :  { %2673 = vmatpush3.bf16.msra.mxu1 %v3025_v14 }
 0x3bb   :  { %2674 = vmatprep.subr.bf16.mxu1 %v3207_v32 }
 0x3be   :  { %2675 = vmatpush3.bf16.msra.mxu1 %v3026_v15 }
 0x3bf   :  { %2676 = vmatprep.subr.bf16.mxu1 %v3207_v32 }
 0x3c2   :  { %2677 = vmatpush3.bf16.msra.mxu1 %v3027_v16 }
 0x478   :  { %v2607_v17 = vpop.f32.mrb[8].mxu1 }
 0x479   :  { %v2608_v19 = vpop.f32.mrb[9].mxu1 }
 0x47a   :  { %v2609_v20 = vadd.f32 %v2608_v19, %v2607_v17  ;;  %v2610_v21 = vpop.f32.mrb[10].mxu1 }
 0x47b   :  { %v2611_v22 = vpop.f32.mrb[11].mxu1 }
 0x47c   :  { %v2158_v23 = vadd.f32 %v2609_v20, %v2503_v18 }
 0x47e   :  { %v2163_v24 = vmax.f32 %v2158_v23, 0.0 }
 0x480   :  { %v2164_v25 = vpack.c.bf16 %v2163_v24, %v2163_v24 }
 0x482   :  { %2679 = vmatmul.mubr.bf16.vlgmr.msra.gmra.mrb[12].mxu1 %v2164_v25 }
 0x555   :  { %v2270_v32 = vpop.f32.mrb[12].mxu1 }
 0x556   :  { %v2271_v27 = vadd.f32 %v2520_v26, %v2270_v32  ;;  %v2680_v28 = vpop.f32.mrb[13].mxu1 }
 0x557   :  { %v2273_v31 = vpop.f32.mrb[14].mxu1 }
 0x558   :  { %2276 = vst [vmem:[#allocation13] sm:$0xff] %v2271_v27  ;;  %v2681_v10 = vpop.f32.mrb[15].mxu1 }
 0x559   :  { %3171 = shalt.err (!%p3168_p10)
}
 0x55a   :  { %s3172_s10 = scalar_lea.hbm %s3458_s11, 128 }
 0x55b   :  { %p3173_p11 = scmp.ne.s32.totalorder %s3458_s11, %s3172_s10  ;;  %p3176_p12 = scmp.lt.u32.totalorder %s3172_s10, %s3458_s11 }
 0x55d   :  { %p3178_p13 = pnand %p3176_p12, %p3173_p11 }
 0x55f   :  { %3181 = shalt.err (!%p3178_p13)
}
 0x560   :  { %2286 = dma.vmem_to_hbm [thread:$0]  %s2284_s20, 128, %s3458_s11, [#allocation4]  }
 0x561   :  { %3190 = dma.done.wait [#allocation4], 128  }
 0x562   :  { %3191 = vsyncadd [#allocation4], 4294967168 }
 0x563   :  { %2290 = vsyncpa [#allocation3], 1 }
 0x564   :  { %2291 = vsyncpa [#allocation6], 1 }
 0x565   :  { %2292 = vsyncpa [#allocation9], 1 }
 0x566   :  { %2293 = vsyncpa [#allocation12], 1 }
 0x567   :  { %2294 = vsyncpa [#allocation4], 1 }

</bundles_post_ra>
